<compile_context>
chip_gen: v5e
topology: v5e:2x2
jax: 0.10.0
libtpu: 0.0.40
codegen_flags: <defaults>
</compile_context>

<pallas_src>
import functools

import jax
import jax.numpy as jnp
from jax import lax
from jax.experimental import pallas as pl
from jax.experimental.pallas import tpu as pltpu

BN_EPS = 1e-5
MATMUL_DTYPE = jnp.bfloat16   # MXU operand dtype (accumulation is always f32)
LANE = 128                    # output padded to a multiple of this lane width
MAX_TILE_B = 2048             # batch rows per grid step (multiple of 8)


def _cdiv(a, b):
    return -(-a // b)


def _round_up(x, m):
    return _cdiv(x, m) * m


# ---------------------------------------------------------------------------
# Fused kernel (batch <= MAX_TILE_B): whole forward in one pallas_call.
# h1 is VMEM-resident, so BN stats use the stable deviation form.
# ---------------------------------------------------------------------------
def _qnet_fused_kernel(x_ref, w1_ref, b1_ref, gamma_ref, beta_ref,
                       w2_ref, b2_ref, wa_ref, ba_ref, out_ref):
    h1 = jnp.dot(x_ref[...].astype(MATMUL_DTYPE), w1_ref[...],
                 preferred_element_type=jnp.float32) + b1_ref[...]

    # Train-mode BatchNorm over the (full, unpadded) batch; folded to one FMA.
    mean = jnp.mean(h1, axis=0, keepdims=True)
    dev = h1 - mean
    var = jnp.mean(dev * dev, axis=0, keepdims=True)   # biased, stable form
    scale = gamma_ref[...] * lax.rsqrt(var + BN_EPS)
    shift = beta_ref[...] - mean * scale
    h1 = jnp.maximum(h1 * scale + shift, 0.0)

    h2 = jnp.dot(h1.astype(MATMUL_DTYPE), w2_ref[...],
                 preferred_element_type=jnp.float32) + b2_ref[...]
    h2 = jnp.maximum(h2, 0.0)

    q = jnp.tanh(jnp.dot(h2.astype(MATMUL_DTYPE), wa_ref[...],
                         preferred_element_type=jnp.float32) + ba_ref[...])
    out_ref[...] = (q * 10.0).astype(out_ref.dtype)


# ---------------------------------------------------------------------------
# Large-batch pass 1: fc1 on one batch tile + partial BN statistics
# (sum and sum-of-squares merged into a single (1, 2, hidden) output block).
# ---------------------------------------------------------------------------
def _bn_stats_kernel(x_ref, w1_ref, b1_ref, stats_ref, *,
                     tile_b, true_batch, needs_mask):
    h1 = jnp.dot(x_ref[...].astype(MATMUL_DTYPE), w1_ref[...],
                 preferred_element_type=jnp.float32) + b1_ref[...]
    if needs_mask:  # zero padded rows so they don't pollute the statistics
        row = (pl.program_id(0) * tile_b
               + lax.broadcasted_iota(jnp.int32, (tile_b, 1), 0))
        h1 = h1 * (row < true_batch).astype(jnp.float32)
    s = jnp.sum(h1, axis=0, keepdims=True)
    ss = jnp.sum(h1 * h1, axis=0, keepdims=True)
    stats_ref[...] = jnp.concatenate([s, ss], axis=0)[None]


# ---------------------------------------------------------------------------
# Large-batch pass 2: full forward on one batch tile; BN stats folded in-kernel
# from the const-spec partials (no JAX glue between the two pallas_calls).
# ---------------------------------------------------------------------------
def _qnet_kernel(x_ref, w1_ref, b1_ref, stats_ref, gamma_ref, beta_ref,
                 w2_ref, b2_ref, wa_ref, ba_ref, out_ref, *, true_batch):
    h1 = jnp.dot(x_ref[...].astype(MATMUL_DTYPE), w1_ref[...],
                 preferred_element_type=jnp.float32) + b1_ref[...]

    # Fold the per-tile partial stats (a few vregs of VPU work per step).
    inv_n = 1.0 / true_batch
    totals = jnp.sum(stats_ref[...], axis=0)          # (2, hidden)
    mean = totals[0:1, :] * inv_n                      # (1, hidden)
    ex2 = totals[1:2, :] * inv_n
    # One-pass E[x^2]-mean^2 (can cancel if |mean| >> std; the fused path uses
    # the stable deviation form since h1 is fully VMEM-resident there).
    var = jnp.maximum(ex2 - mean * mean, 0.0)
    scale = gamma_ref[...] * lax.rsqrt(var + BN_EPS)
    shift = beta_ref[...] - mean * scale
    h1 = jnp.maximum(h1 * scale + shift, 0.0)

    h2 = jnp.dot(h1.astype(MATMUL_DTYPE), w2_ref[...],
                 preferred_element_type=jnp.float32) + b2_ref[...]
    h2 = jnp.maximum(h2, 0.0)

    q = jnp.tanh(jnp.dot(h2.astype(MATMUL_DTYPE), wa_ref[...],
                         preferred_element_type=jnp.float32) + ba_ref[...])
    out_ref[...] = (q * 10.0).astype(out_ref.dtype)


def prepare_params(params):
    """One-time weight prep (hoisted out of the forward): bf16 MXU operands
    and lane-dense padding of the fc_action weights/bias."""
    w1, b1, gamma, beta, w2, b2, wa, ba = params
    action_dim = wa.shape[1]
    pad = _round_up(action_dim, LANE) - action_dim
    return (
        w1.astype(MATMUL_DTYPE), b1, gamma, beta,
        w2.astype(MATMUL_DTYPE), b2,
        jnp.pad(wa, ((0, 0), (0, pad))).astype(MATMUL_DTYPE),
        jnp.pad(ba, ((0, 0), (0, pad))),
    )


@functools.partial(jax.jit, static_argnames=("action_dim", "max_tile_b"))
def qnetwork_forward(x, prepared, *, action_dim, max_tile_b=MAX_TILE_B):
    """Forward pass.  `prepared` = prepare_params(params)."""
    w1_mm, b1, gamma, beta, w2_mm, b2, wa_mm, ba_pad = prepared
    batch, input_dim = x.shape
    hidden = w1_mm.shape[1]
    padded_adim = wa_mm.shape[1]

    num_tiles = _cdiv(batch, max_tile_b)

    # ---- fused single-kernel path (common Q-network case) ------------------
    if num_tiles == 1:
        q_pad = pl.pallas_call(
            _qnet_fused_kernel,
            out_shape=jax.ShapeDtypeStruct((batch, padded_adim), jnp.float32),
        )(x, w1_mm, b1, gamma, beta, w2_mm, b2, wa_mm, ba_pad)
        return q_pad[:, :action_dim]

    # ---- large batch: balanced tiling, even tile count (v7x megacore) ------
    num_tiles = _round_up(num_tiles, 2)
    tile_b = _round_up(_cdiv(batch, num_tiles), 8)
    padded_batch = tile_b * num_tiles
    needs_mask = padded_batch != batch
    if needs_mask:
        x = jnp.pad(x, ((0, padded_batch - batch), (0, 0)))

    grid = (num_tiles,)
    x_spec = pl.BlockSpec((tile_b, input_dim), lambda i: (i, 0))

    def const_spec(shape):  # whole array, same block every step (VMEM-resident)
        return pl.BlockSpec(shape, lambda i: (0,) * len(shape))

    parallel = pltpu.CompilerParams(dimension_semantics=("parallel",))

    # pass 1: per-tile partial BN statistics (sum / sumsq in one buffer)
    stats = pl.pallas_call(
        functools.partial(_bn_stats_kernel, tile_b=tile_b, true_batch=batch,
                          needs_mask=needs_mask),
        grid=grid,
        in_specs=[x_spec,
                  const_spec((input_dim, hidden)),
                  const_spec((1, hidden))],
        out_specs=pl.BlockSpec((1, 2, hidden), lambda i: (i, 0, 0)),
        out_shape=jax.ShapeDtypeStruct((num_tiles, 2, hidden), jnp.float32),
        compiler_params=parallel,
    )(x, w1_mm, b1)

    # pass 2: full forward; BN stats folded inside the kernel
    q_pad = pl.pallas_call(
        functools.partial(_qnet_kernel, true_batch=batch),
        grid=grid,
        in_specs=[x_spec,
                  const_spec((input_dim, hidden)), const_spec((1, hidden)),
                  const_spec((num_tiles, 2, hidden)),
                  const_spec((1, hidden)), const_spec((1, hidden)),
                  const_spec((hidden, hidden)), const_spec((1, hidden)),
                  const_spec((hidden, padded_adim)), const_spec((1, padded_adim))],
        out_specs=pl.BlockSpec((tile_b, padded_adim), lambda i: (i, 0)),
        out_shape=jax.ShapeDtypeStruct((padded_batch, padded_adim), jnp.float32),
        compiler_params=parallel,
    )(x, w1_mm, b1, stats, gamma, beta, w2_mm, b2, wa_mm, ba_pad)

    return q_pad[:batch, :action_dim]


def init_params(key, input_dim, action_dim, hidden_dim=128):
    """Synthetic init matching the PyTorch module's shapes.

    Linear weights are stored pre-transposed as (in, out); biases / BN params
    as (1, out) rows so they broadcast cleanly inside the kernels.
    """
    k1, k2, k3, k4, k5 = jax.random.split(key, 5)

    def linear_init(kw, kb, fan_in, fan_out):
        bound = 1.0 / float(fan_in) ** 0.5
        w = jax.random.uniform(kw, (fan_in, fan_out), jnp.float32, -bound, bound)
        b = jax.random.uniform(kb, (1, fan_out), jnp.float32, -bound, bound)
        return w, b

    w1, b1 = linear_init(k1, k2, input_dim, hidden_dim)
    w2, b2 = linear_init(k3, k4, hidden_dim, hidden_dim)
    # fc_action: nn.init.uniform_(weight, -0.01, 0.01), zero bias
    wa = jax.random.uniform(k5, (hidden_dim, action_dim), jnp.float32, -0.01, 0.01)
    ba = jnp.zeros((1, action_dim), jnp.float32)
    # BatchNorm1d affine params: weight=1, bias=0
    gamma = jnp.ones((1, hidden_dim), jnp.float32)
    beta = jnp.zeros((1, hidden_dim), jnp.float32)
    return (w1, b1, gamma, beta, w2, b2, wa, ba)


def qnetwork_reference(x, params, matmul_dtype=jnp.float32):
    """Pure-JAX reference; matmul_dtype lets it mirror the kernel's MXU precision."""
    w1, b1, gamma, beta, w2, b2, wa, ba = params

    def mm(a, w):
        return jnp.dot(a.astype(matmul_dtype), w.astype(matmul_dtype),
                       preferred_element_type=jnp.float32)

    h1 = mm(x, w1) + b1
    mean = jnp.mean(h1, axis=0, keepdims=True)
    var = jnp.mean(jnp.square(h1 - mean), axis=0, keepdims=True)
    scale = gamma * lax.rsqrt(var + BN_EPS)
    shift = beta - mean * scale
    h1 = jnp.maximum(h1 * scale + shift, 0.0)
    h2 = jnp.maximum(mm(h1, w2) + b2, 0.0)
    return jnp.tanh(mm(h2, wa) + ba) * 10.0


if __name__ == "__main__":
    key = jax.random.PRNGKey(0)
    k_params, k_x = jax.random.split(key)

    batch, input_dim, hidden_dim, action_dim = 8, 64, 128, 32
    params = init_params(k_params, input_dim, action_dim, hidden_dim)
    prepared = prepare_params(params)
    x = jax.random.normal(k_x, (batch, input_dim), jnp.float32)

    # Fused single-kernel path.
    q = qnetwork_forward(x, prepared, action_dim=action_dim)
    jax.block_until_ready(q)
    assert q.shape == (batch, action_dim)

    # Tight check vs a reference mirroring the kernel's MXU operand precision.
    q_mirror = qnetwork_reference(x, params, matmul_dtype=MATMUL_DTYPE)
    assert jnp.allclose(q, q_mirror, atol=5e-3, rtol=5e-3), \
        "mismatch vs precision-matched reference (fused path)"

    # Sanity check vs the full-float32 (PyTorch-semantics) reference; tolerance
    # is looser only because the kernel feeds bf16 operands to the MXU.
    q_f32 = qnetwork_reference(x, params, matmul_dtype=jnp.float32)
    assert jnp.allclose(q, q_f32, atol=0.25), "mismatch vs float32 reference"

    # Also exercise the tiled two-pass path (ragged batch + row masking) by
    # forcing a tiny tile size.
    batch2 = 20
    x2 = jax.random.normal(jax.random.PRNGKey(1), (batch2, input_dim), jnp.float32)
    q2 = qnetwork_forward(x2, prepared, action_dim=action_dim, max_tile_b=8)
    jax.block_until_ready(q2)
    assert q2.shape == (batch2, action_dim)
    q2_mirror = qnetwork_reference(x2, params, matmul_dtype=MATMUL_DTYPE)
    assert jnp.allclose(q2, q2_mirror, atol=5e-3, rtol=5e-3), \
        "mismatch vs precision-matched reference (tiled path)"

    print("KERNEL_OK")
</pallas_src>

<mosaic_0001>
module attributes {stable_mosaic.version = 11 : i64} {
  func.func @_qnet_fused_kernel(%arg0: memref<8x64xf32, #tpu.memory_space<vmem>>, %arg1: memref<64x128xbf16, #tpu.memory_space<vmem>>, %arg2: memref<1x128xf32, #tpu.memory_space<vmem>>, %arg3: memref<1x128xf32, #tpu.memory_space<vmem>>, %arg4: memref<1x128xf32, #tpu.memory_space<vmem>>, %arg5: memref<128x128xbf16, #tpu.memory_space<vmem>>, %arg6: memref<1x128xf32, #tpu.memory_space<vmem>>, %arg7: memref<128x128xbf16, #tpu.memory_space<vmem>>, %arg8: memref<1x128xf32, #tpu.memory_space<vmem>>, %arg9: memref<8x128xf32, #tpu.memory_space<vmem>>) attributes {dimension_semantics = [], scalar_prefetch = 0 : i64, scratch_operands = 0 : i64, tpu.core_type = #tpu.core_type<tc>} {
    %c0 = arith.constant 0 : index
    %c0_0 = arith.constant 0 : index
    %0 = vector.load %arg0[%c0, %c0_0] : memref<8x64xf32, #tpu.memory_space<vmem>>, vector<8x64xf32>
    %1 = arith.truncf %0 : vector<8x64xf32> to vector<8x64xbf16>
    %c0_1 = arith.constant 0 : index
    %c0_2 = arith.constant 0 : index
    %2 = vector.load %arg1[%c0_1, %c0_2] : memref<64x128xbf16, #tpu.memory_space<vmem>>, vector<64x128xbf16>
    %cst = arith.constant dense<0.000000e+00> : vector<8x128xf32>
    %3 = tpu.matmul %1, %2, %cst {dimension_numbers = #tpu.dot_dimension_numbers<[1], [0], [0], [1], [0, 0, 1, 1], [], []>} : vector<8x64xbf16>, vector<64x128xbf16>, vector<8x128xf32> -> vector<8x128xf32>
    %c0_3 = arith.constant 0 : index
    %c0_4 = arith.constant 0 : index
    %4 = vector.load %arg2[%c0_3, %c0_4] : memref<1x128xf32, #tpu.memory_space<vmem>>, vector<1x128xf32>
    %5 = vector.broadcast %4 : vector<1x128xf32> to vector<8x128xf32>
    %6 = arith.addf %3, %5 : vector<8x128xf32>
    %cst_5 = arith.constant dense<0.000000e+00> : vector<128xf32>
    %7 = vector.multi_reduction <add>, %6, %cst_5 [0] : vector<8x128xf32> to vector<128xf32>
    %8 = vector.shape_cast %7 : vector<128xf32> to vector<1x128xf32>
    %cst_6 = arith.constant 8.000000e+00 : f32
    %9 = vector.broadcast %cst_6 : f32 to vector<1x128xf32>
    %10 = arith.divf %8, %9 : vector<1x128xf32>
    %11 = vector.broadcast %10 : vector<1x128xf32> to vector<8x128xf32>
    %12 = arith.subf %6, %11 : vector<8x128xf32>
    %13 = arith.mulf %12, %12 : vector<8x128xf32>
    %cst_7 = arith.constant dense<0.000000e+00> : vector<128xf32>
    %14 = vector.multi_reduction <add>, %13, %cst_7 [0] : vector<8x128xf32> to vector<128xf32>
    %15 = vector.shape_cast %14 : vector<128xf32> to vector<1x128xf32>
    %cst_8 = arith.constant 8.000000e+00 : f32
    %16 = vector.broadcast %cst_8 : f32 to vector<1x128xf32>
    %17 = arith.divf %15, %16 : vector<1x128xf32>
    %c0_9 = arith.constant 0 : index
    %c0_10 = arith.constant 0 : index
    %18 = vector.load %arg3[%c0_9, %c0_10] : memref<1x128xf32, #tpu.memory_space<vmem>>, vector<1x128xf32>
    %cst_11 = arith.constant 9.99999974E-6 : f32
    %19 = vector.broadcast %cst_11 : f32 to vector<1x128xf32>
    %20 = arith.addf %17, %19 : vector<1x128xf32>
    %21 = math.rsqrt %20 : vector<1x128xf32>
    %22 = arith.mulf %18, %21 : vector<1x128xf32>
    %c0_12 = arith.constant 0 : index
    %c0_13 = arith.constant 0 : index
    %23 = vector.load %arg4[%c0_12, %c0_13] : memref<1x128xf32, #tpu.memory_space<vmem>>, vector<1x128xf32>
    %24 = arith.mulf %10, %22 : vector<1x128xf32>
    %25 = arith.subf %23, %24 : vector<1x128xf32>
    %26 = vector.broadcast %22 : vector<1x128xf32> to vector<8x128xf32>
    %27 = arith.mulf %6, %26 : vector<8x128xf32>
    %28 = vector.broadcast %25 : vector<1x128xf32> to vector<8x128xf32>
    %29 = arith.addf %27, %28 : vector<8x128xf32>
    %cst_14 = arith.constant 0.000000e+00 : f32
    %30 = vector.broadcast %cst_14 : f32 to vector<8x128xf32>
    %31 = arith.maximumf %29, %30 : vector<8x128xf32>
    %32 = arith.truncf %31 : vector<8x128xf32> to vector<8x128xbf16>
    %c0_15 = arith.constant 0 : index
    %c0_16 = arith.constant 0 : index
    %33 = vector.load %arg5[%c0_15, %c0_16] : memref<128x128xbf16, #tpu.memory_space<vmem>>, vector<128x128xbf16>
    %cst_17 = arith.constant dense<0.000000e+00> : vector<8x128xf32>
    %34 = tpu.matmul %32, %33, %cst_17 {dimension_numbers = #tpu.dot_dimension_numbers<[1], [0], [0], [1], [0, 0, 1, 1], [], []>} : vector<8x128xbf16>, vector<128x128xbf16>, vector<8x128xf32> -> vector<8x128xf32>
    %c0_18 = arith.constant 0 : index
    %c0_19 = arith.constant 0 : index
    %35 = vector.load %arg6[%c0_18, %c0_19] : memref<1x128xf32, #tpu.memory_space<vmem>>, vector<1x128xf32>
    %36 = vector.broadcast %35 : vector<1x128xf32> to vector<8x128xf32>
    %37 = arith.addf %34, %36 : vector<8x128xf32>
    %cst_20 = arith.constant 0.000000e+00 : f32
    %38 = vector.broadcast %cst_20 : f32 to vector<8x128xf32>
    %39 = arith.maximumf %37, %38 : vector<8x128xf32>
    %40 = arith.truncf %39 : vector<8x128xf32> to vector<8x128xbf16>
    %c0_21 = arith.constant 0 : index
    %c0_22 = arith.constant 0 : index
    %41 = vector.load %arg7[%c0_21, %c0_22] : memref<128x128xbf16, #tpu.memory_space<vmem>>, vector<128x128xbf16>
    %cst_23 = arith.constant dense<0.000000e+00> : vector<8x128xf32>
    %42 = tpu.matmul %40, %41, %cst_23 {dimension_numbers = #tpu.dot_dimension_numbers<[1], [0], [0], [1], [0, 0, 1, 1], [], []>} : vector<8x128xbf16>, vector<128x128xbf16>, vector<8x128xf32> -> vector<8x128xf32>
    %c0_24 = arith.constant 0 : index
    %c0_25 = arith.constant 0 : index
    %43 = vector.load %arg8[%c0_24, %c0_25] : memref<1x128xf32, #tpu.memory_space<vmem>>, vector<1x128xf32>
    %44 = vector.broadcast %43 : vector<1x128xf32> to vector<8x128xf32>
    %45 = arith.addf %42, %44 : vector<8x128xf32>
    %46 = math.tanh %45 : vector<8x128xf32>
    %cst_26 = arith.constant 1.000000e+01 : f32
    %47 = vector.broadcast %cst_26 : f32 to vector<8x128xf32>
    %48 = arith.mulf %46, %47 : vector<8x128xf32>
    %c0_27 = arith.constant 0 : index
    %c0_28 = arith.constant 0 : index
    %49 = vector.load %arg9[%c0_27, %c0_28] : memref<8x128xf32, #tpu.memory_space<vmem>>, vector<8x128xf32>
    tpu.vector_store %arg9[%c0_27, %c0_28], %48 {strides = array<i32>} : memref<8x128xf32, #tpu.memory_space<vmem>>, vector<8x128xf32>,
    return
  }
}

</mosaic_0001>

<bundles_post_ra>
// kernel: qnetwork_forward.1
= control target key start
LH: loop header
LB: loop body
LE: loop exit
PB: predicated region body
PF: predicated region fallthrough
CT: control target
= control target key end

     0   :  { %14 = vsyncpa [#allocation3], 0  ;;  %s725_s0 = inlined_call_operand.hbm [shape: f32[8,64], index: 0, kind: input, shape index: {}]   ;;  %s726_s1 = inlined_call_operand.hbm [shape: bf16[64,128], index: 1, kind: input, shape index: {}]   ;;  %s727_s2 = inlined_call_operand.vmem [shape: f32[1,128], index: 2, kind: input, shape index: {}]   ;;  %s728_s3 = inlined_call_operand.vmem [shape: f32[1,128], index: 3, kind: input, shape index: {}]   ;;  %s729_s4 = inlined_call_operand.vmem [shape: f32[1,128], index: 4, kind: input, shape index: {}]   ;;  %s730_s5 = inlined_call_operand.hbm [shape: bf16[128,128], index: 5, kind: input, shape index: {}]   ;;  %s731_s6 = inlined_call_operand.vmem [shape: f32[1,128], index: 6, kind: input, shape index: {}]   ;;  %s732_s7 = inlined_call_operand.hbm [shape: bf16[128,128], index: 7, kind: input, shape index: {}]   ;;  %s733_s8 = inlined_call_operand.vmem [shape: f32[1,128], index: 8, kind: input, shape index: {}]   ;;  %s734_s9 = inlined_call_operand.hbm [shape: f32[8,128], index: 9, kind: output, shape index: {}]  }
   0x1   :  { %15 = vsyncpa [#allocation6], 0 }
   0x2   :  { %16 = vsyncpa [#allocation9], 0  ;;  %s33_s11 = sshll.u32 %s726_s1, 4  ;;  %s34_s11 = int_to_ptr.hbm [resolvable:$true] %s33_s11 }
   0x3   :  { %17 = vsyncpa [#allocation4], 0  ;;  %s631_s12 = smov [#allocation5]   ;;  %s23_s16 = sshll.u32 %s725_s0, 4  ;;  %s24_s16 = int_to_ptr.hbm [resolvable:$true] %s23_s16 }
   0x4   :  { %s35_s13 = sshll.u32 %s631_s12, 4  ;;  %s632_s17 = smov 64   ;;  %s36_s13 = int_to_ptr.vmem [resolvable:$true] %s35_s13 }
   0x5   :  { %s633_s18 = smov 4   ;;  %s634_s19 = smov [#allocation2]  }
   0x6   :  { %41 = dma.hbm_to_vmem [thread:$0]  %s34_s11, 512, %s36_s13, [#allocation6], %s632_s17, %s632_s17, %s633_s18  }
   0x7   :  { %s25_s20 = sshll.u32 %s634_s19, 4  ;;  %s52_s23 = sshll.u32 %s730_s5, 4  ;;  %s26_s20 = int_to_ptr.vmem [resolvable:$true] %s25_s20  ;;  %s53_s23 = int_to_ptr.hbm [resolvable:$true] %s52_s23 }
   0x8   :  { %28 = dma.hbm_to_vmem [thread:$0]  %s24_s16, 128, %s26_s20, [#allocation3]  }
   0x9   :  { %s67_s25 = sshll.u32 %s732_s7, 4  ;;  %s635_s26 = smov [#allocation7]   ;;  %s68_s25 = int_to_ptr.hbm [resolvable:$true] %s67_s25 }
   0xa   :  { %s54_s27 = sshll.u32 %s635_s26, 4  ;;  %s636_s0 = smov [#allocation8]   ;;  %s55_s27 = int_to_ptr.vmem [resolvable:$true] %s54_s27 }
   0xb   :  { %60 = dma.hbm_to_vmem [thread:$0]  %s53_s23, 1024, %s55_s27, [#allocation6], %s632_s17, %s632_s17, %s633_s18  }
   0xc   :  { %s69_s28 = sshll.u32 %s636_s0, 4  ;;  %s70_s28 = int_to_ptr.vmem [resolvable:$true] %s69_s28 }
   0xd   :  { %75 = dma.hbm_to_vmem [thread:$0]  %s68_s25, 1024, %s70_s28, [#allocation9], %s632_s17, %s632_s17, %s633_s18  }
   0xe   :  { %623 = dma.done.wait [#allocation3], 128  }
   0xf   :  { %624 = vsyncadd [#allocation3], 4294967168 }
  0x10   :  { %625 = dma.done.wait [#allocation6], 1536  }
  0x11   :  { %626 = vsyncadd [#allocation6], 4294965760 }
  0x12   :  { %627 = dma.done.wait [#allocation9], 1024  }
  0x13   :  { %628 = vsyncadd [#allocation9], 4294966272  ;;  %v469_v0 = vld [vmem:[#allocation5 + $0x18] sm:$0xff]  ;;  %v468_v1 = vld [vmem:[#allocation5 + $0x10] sm:$0xff]  ;;  %vm133_vm0 = vcmask 523264   ;;  %v637_v6 = vmov 8.0  }
  0x14   :  { %141 = vmatpush.bf16.msra.mxu0 %v469_v0  ;;  %v467_v2 = vld [vmem:[#allocation5 + $0x8] sm:$0xff]  ;;  %v466_v3 = vld [vmem:[#allocation5] sm:$0xff]  ;;  %v95_v4 = vld [vmem:[#allocation2] sm:$0xff]  ;;  %497 = vrcp.f32 %v637_v6  ;;  %s638_s13 = smov [#allocation10]   ;;  %s373_s17 = sshll.u32 %s734_s9, 4  ;;  %s374_s17 = int_to_ptr.hbm [resolvable:$true] %s373_s17 }
  0x15   :  { %v96_v5 = vpack.c.bf16 %v95_v4, %v95_v4  ;;  %v494_v9 = vld [vmem:[%s727_s2] ss:$0 sm:$0xff]  ;;  %v476_v20 = vld [vmem:[#allocation7 + $0x30] sm:$0xff]  ;;  %v475_v24 = vld [vmem:[#allocation7 + $0x28] sm:$0xff]  ;;  %s371_s14 = sshll.u32 %s638_s13, 4  ;;  %s372_s14 = int_to_ptr.vmem [resolvable:$true] %s371_s14 }
  0x16   :  { %v477_v15 = vld [vmem:[#allocation7 + $0x38] sm:$0xff]  ;;  %v474_v26 = vld [vmem:[#allocation7 + $0x20] sm:$0xff]  ;;  %v472_v32 = vld [vmem:[#allocation7 + $0x10] sm:$0xff] }
  0x17   :  { %267 = vmatpush.bf16.msra.mxu1 %v477_v15  ;;  %v473_v29 = vld [vmem:[#allocation7 + $0x18] sm:$0xff]  ;;  %v471_v35 = vld [vmem:[#allocation7 + $0x8] sm:$0xff]  ;;  %v470_v38 = vld [vmem:[#allocation7] sm:$0xff] }
  0x18   :  { %142 = vmatpush.bf16.msra.mxu0 %v468_v1  ;;  %v485_v42 = vld [vmem:[#allocation8 + $0x38] sm:$0xff]  ;;  %v484_v43 = vld [vmem:[#allocation8 + $0x30] sm:$0xff]  ;;  %v483_v45 = vld [vmem:[#allocation8 + $0x28] sm:$0xff] }
  0x19   :  { %350 = vmatpush.bf16.msra.mxu2 %v485_v42  ;;  %v482_v48 = vld [vmem:[#allocation8 + $0x20] sm:$0xff]  ;;  %v481_v51 = vld [vmem:[#allocation8 + $0x18] sm:$0xff]  ;;  %v480_v56 = vld [vmem:[#allocation8 + $0x10] sm:$0xff] }
  0x1a   :  { %v498_v7 = vpop.eup %497  ;;  %v173_v52 = vld [vmem:[%s728_s3] sm:$0x1] }
  0x1b   :  { %v157_v8 = vmul.f32 8.0, %v498_v7  ;;  %vm161_vm1 = vweird.f32 %v498_v7  ;;  %268 = vmatpush.bf16.msra.mxu1 %v476_v20  ;;  %v186_v57 = vld [vmem:[%s729_s4] sm:$0x1] }
  0x1c   :  { %143 = vmatpush.bf16.msra.mxu0 %v467_v2  ;;  %v479_v2 = vld [vmem:[#allocation8 + $0x8] sm:$0xff]  ;;  %v495_v4 = vld [vmem:[%s731_s6] ss:$0 sm:$0xff] }
  0x1d   :  { %v158_v11 = vsub.f32 1.0, %v157_v8  ;;  %351 = vmatpush.bf16.msra.mxu2 %v484_v43 }
  0x1f   :  { %v159_v14 = vmul.f32 %v498_v7, %v158_v11  ;;  %269 = vmatpush.bf16.msra.mxu1 %v475_v24 }
  0x20   :  { %144 = vmatpush.bf16.msra.mxu0 %v466_v3  ;;  %v478_v3 = vld [vmem:[#allocation8] sm:$0xff] }
  0x21   :  { %v160_v18 = vadd.f32 %v498_v7, %v159_v14  ;;  %352 = vmatpush.bf16.msra.mxu2 %v483_v45 }
  0x23   :  { %401 = vmatmul.msk.bf16.vlgmr.msra.gmra.mxu0 %vm133_vm0, %v96_v5  ;;  %v162_v23 = vsel %vm161_vm1, %v498_v7, %v160_v18  ;;  %270 = vmatpush.bf16.msra.mxu1 %v474_v26 }
  0x25   :  { %353 = vmatpush.bf16.msra.mxu2 %v482_v48 }
  0x27   :  { %271 = vmatpush.bf16.msra.mxu1 %v473_v29 }
  0x29   :  { %354 = vmatpush.bf16.msra.mxu2 %v481_v51 }
  0x2b   :  { %272 = vmatpush.bf16.msra.mxu1 %v472_v32 }
  0x2d   :  { %355 = vmatpush.bf16.msra.mxu2 %v480_v56 }
  0x2f   :  { %273 = vmatpush.bf16.msra.mxu1 %v471_v35 }
  0x31   :  { %356 = vmatpush.bf16.msra.mxu2 %v479_v2 }
  0x33   :  { %274 = vmatpush.bf16.msra.mxu1 %v470_v38 }
  0x35   :  { %357 = vmatpush.bf16.msra.mxu2 %v478_v3 }
  0xa0   :  { %v146_v10 = vpop.f32.mrf.mxu0 }
  0xa1   :  { %v704_v12 = vadd.f32 %v494_v9, %v146_v10  ;;  %v496_v10 = vld [vmem:[%s733_s8] ss:$0 sm:$0xff] }
  0xa3   :  { %v150_v13 = vrot.slane %v704_v12, 4 }
  0xa5   :  { %v151_v16 = vadd.f32 %v150_v13, %v704_v12 }
  0xa7   :  { %v152_v17 = vrot.slane %v151_v16, 2 }
  0xa8   :  { %v148_v19 = vpop.f32.mrf.mxu0 }
  0xa9   :  { %v153_v21 = vadd.f32 %v152_v17, %v151_v16 }
  0xab   :  { %v154_v22 = vrot.slane %v153_v21, 1 }
  0xad   :  { %v155_v25 = vadd.f32 %v154_v22, %v153_v21 }
  0xaf   :  { %v163_v27 = vmul.f32 %v162_v23, %v155_v25 }
  0xb1   :  { %v164_v28 = vsub.f32 %v704_v12, %v163_v27 }
  0xb3   :  { %v165_v30 = vmul.f32 %v164_v28, %v164_v28 }
  0xb5   :  { %v166_v31 = vrot.slane %v165_v30, 4 }
  0xb7   :  { %v167_v33 = vadd.f32 %v166_v31, %v165_v30 }
  0xb9   :  { %v168_v34 = vrot.slane %v167_v33, 2 }
  0xbb   :  { %v169_v36 = vadd.f32 %v168_v34, %v167_v33 }
  0xbd   :  { %v170_v37 = vrot.slane %v169_v36, 1 }
  0xbf   :  { %v171_v39 = vadd.f32 %v170_v37, %v169_v36 }
  0xc1   :  { %v172_v40 = vmul.f32 %v171_v39, %v162_v23 }
  0xc3   :  { %v174_v41 = vadd.f32 1e-05, %v172_v40 }
  0xc5   :  { %499 = vrsqrt.f32 %v174_v41  ;;  %vm181_vm3 = vweird.f32 %v174_v41 }
  0xcb   :  { %v500_v44 = vpop.eup %499 }
  0xcc   :  { %v176_v46 = vmul.f32 %v500_v44, %v174_v41  ;;  %vm182_vm2 = vweird.f32 %v500_v44 }
  0xcd   :  { %vm183_vm4 = vmor %vm181_vm3, %vm182_vm2 }
  0xce   :  { %v177_v47 = vmul.f32 %v500_v44, %v176_v46 }
  0xd0   :  { %v178_v49 = vmul.f32 0.5, %v177_v47 }
  0xd2   :  { %v179_v50 = vsub.f32 1.5, %v178_v49 }
  0xd4   :  { %v180_v53 = vmul.f32 %v500_v44, %v179_v50 }
  0xd6   :  { %v184_v54 = vsel %vm183_vm4, %v500_v44, %v180_v53 }
  0xd7   :  { %v185_v55 = vmul.f32 %v184_v54, %v173_v52 }
  0xd9   :  { %v187_v58 = vmul.f32 %v185_v55, %v163_v27  ;;  %v190_v59 = vperm.slane %v185_v55, 0 }
  0xdb   :  { %v188_v60 = vsub.f32 %v186_v57, %v187_v58  ;;  %v192_v61 = vmul.f32 %v190_v59, %v704_v12 }
  0xdd   :  { %v194_v62 = vperm.slane %v188_v60, 0 }
  0xdf   :  { %v196_v63 = vadd.f32 %v194_v62, %v192_v61 }
  0xe1   :  { %v197_v0 = vmax.f32 %v196_v63, 0.0 }
  0xe3   :  { %v198_v1 = vpack.c.bf16 %v197_v0, %v197_v0 }
  0xe5   :  { %275 = vmatmul.bf16.vlgmr.msra.gmra.mxu1 %v198_v1 }
 0x162   :  { %v276_v5 = vpop.f32.mrf.mxu1 }
 0x163   :  { %v277_v6 = vadd.f32 %v495_v4, %v276_v5 }
 0x165   :  { %v280_v7 = vmax.f32 %v277_v6, 0.0 }
 0x167   :  { %v281_v8 = vpack.c.bf16 %v280_v7, %v280_v7 }
 0x169   :  { %358 = vmatmul.bf16.vlgmr.msra.gmra.mxu2 %v281_v8 }
 0x16a   :  { %v278_v9 = vpop.f32.mrf.mxu1 }
 0x1ec   :  { %v359_v11 = vpop.f32.mrf.mxu2 }
 0x1ed   :  { %v360_v12 = vadd.f32 %v496_v10, %v359_v11 }
 0x1ef   :  { %501 = vtanh.f32 %v360_v12 }
 0x1f4   :  { %v361_v13 = vpop.f32.mrf.mxu2 }
 0x1f5   :  { %v502_v14 = vpop.eup %501 }
 0x1f6   :  { %v364_v15 = vmul.f32 10.0, %v502_v14 }
 0x1f8   :  { %365 = vst [vmem:[#allocation10] sm:$0xff] %v364_v15 }
 0x1f9   :  { %376 = dma.vmem_to_hbm [thread:$0]  %s372_s14, 128, %s374_s17, [#allocation4]  }
 0x1fa   :  { %629 = dma.done.wait [#allocation4], 128  }
 0x1fb   :  { %630 = vsyncadd [#allocation4], 4294967168 }
 0x1fc   :  { %381 = vsyncpa [#allocation3], 1 }
 0x1fd   :  { %382 = vsyncpa [#allocation6], 1 }
 0x1fe   :  { %383 = vsyncpa [#allocation9], 1 }
 0x1ff   :  { %384 = vsyncpa [#allocation4], 1 }

</bundles_post_ra>
